<compile_context>
chip_gen: v5e
topology: v5e:2x2
jax: 0.10.0
libtpu: 0.0.40
codegen_flags: <defaults>
</compile_context>

<pallas_src>
import jax
import jax.numpy as jnp
from jax.experimental import pallas as pl
from jax.experimental.pallas import tpu as pltpu


def deep_recommender_kernel(um_ref, meta_ref, w1um_ref, wcomb_ref,
                            b1_ref, w2_ref, b2_ref, out_ref):
    # Hidden layer: concat([ue, me, metadata @ Wdr + bdr]) @ W1 + b1, with the
    # dim_reduction linear pre-folded into wcomb / b1_eff on the host side.
    h = (jnp.dot(um_ref[...], w1um_ref[...], preferred_element_type=jnp.float32)
         + jnp.dot(meta_ref[...], wcomb_ref[...], preferred_element_type=jnp.float32)
         + b1_ref[...])

    # Dropout(0.2): identity under eval semantics.

    # Linear(hidden, 1): N=1 matmul -> VPU multiply + lane reduction (keeps MXU free).
    out_ref[...] = jnp.sum(h * w2_ref[...], axis=-1, keepdims=True) + b2_ref[...]


def deep_recommender_forward(user, movie, metadata, params, *, max_tile=1024):
    # Embedding lookups = gathers (glue, not the hot path).
    ue = params["user_emb"][user]    # (B, UE)
    me = params["movie_emb"][movie]  # (B, ME)
    um = jnp.concatenate([ue, me], axis=-1)            # (B, UE+ME)

    UE = params["user_emb"].shape[1]
    ME = params["movie_emb"].shape[1]
    UM = UE + ME
    H = params["b1"].shape[-1]
    B, DMETA = metadata.shape

    # Fold dim_reduction into the first output Linear (no nonlinearity between them):
    #   concat([um, meta @ Wdr + bdr]) @ W1 + b1
    #   == um @ W1[:UM] + meta @ (Wdr @ W1[UM:]) + (b1 + bdr @ W1[UM:])
    w1 = params["w1"]                                   # (UM + metadata_size, H)
    w1_um = w1[:UM]                                     # (UM, H)
    w1_d = w1[UM:]                                      # (metadata_size, H)
    w_comb = params["w_dr"] @ w1_d                      # (768, H)
    b1_eff = (params["b1"] + params["b_dr"] @ w1_d).astype(jnp.float32)   # (1, H)
    w2_row = params["w2"].reshape(1, H).astype(jnp.float32)               # (1, H)
    b2 = params["b2"].reshape(1, 1).astype(jnp.float32)                   # (1, 1)

    # bf16 for the HBM-bound streams / weight matrices; f32 accumulation in-kernel.
    um_b = um.astype(jnp.bfloat16)
    meta_b = metadata.astype(jnp.bfloat16)
    w1_um_b = w1_um.astype(jnp.bfloat16)
    w_comb_b = w_comb.astype(jnp.bfloat16)

    # Batch tiling: biggest tile up to max_tile, padded so the grid divides evenly.
    TB = min(max_tile, max(8, pl.cdiv(B, 8) * 8))
    B_pad = pl.cdiv(B, TB) * TB
    if B_pad != B:
        um_b = jnp.pad(um_b, ((0, B_pad - B), (0, 0)))
        meta_b = jnp.pad(meta_b, ((0, B_pad - B), (0, 0)))

    out = pl.pallas_call(
        deep_recommender_kernel,
        out_shape=jax.ShapeDtypeStruct((B_pad, 1), jnp.float32),
        grid=(B_pad // TB,),
        in_specs=[
            pl.BlockSpec((TB, UM), lambda i: (i, 0)),       # um (batch-tiled)
            pl.BlockSpec((TB, DMETA), lambda i: (i, 0)),    # metadata (batch-tiled)
            pl.BlockSpec((UM, H), lambda i: (0, 0)),        # W1[:UM]      (resident)
            pl.BlockSpec((DMETA, H), lambda i: (0, 0)),     # Wdr @ W1[UM:](resident)
            pl.BlockSpec((1, H), lambda i: (0, 0)),         # b1_eff       (resident)
            pl.BlockSpec((1, H), lambda i: (0, 0)),         # w2 row       (resident)
            pl.BlockSpec((1, 1), lambda i: (0, 0)),         # b2           (resident)
        ],
        out_specs=pl.BlockSpec((TB, 1), lambda i: (i, 0)),
        compiler_params=pltpu.CompilerParams(
            dimension_semantics=("parallel",),
            vmem_limit_bytes=32 * 1024 * 1024,
        ),
    )(um_b, meta_b, w1_um_b, w_comb_b, b1_eff, w2_row, b2)
    return out[:B]


def init_params(key, *, users, movies, user_emb_size, movie_emb_size,
                metadata_size, hidden_size):
    ks = jax.random.split(key, 8)
    concat_size = user_emb_size + movie_emb_size + metadata_size

    def lin_init(k, fan_in, fan_out):
        # Kaiming-uniform-ish, deterministic; stored as [in, out] (x @ W + b).
        bound = 1.0 / jnp.sqrt(fan_in)
        return jax.random.uniform(k, (fan_in, fan_out), jnp.float32, -bound, bound)

    return {
        "user_emb":  jax.random.normal(ks[0], (users, user_emb_size), jnp.float32),
        "movie_emb": jax.random.normal(ks[1], (movies, movie_emb_size), jnp.float32),
        "w_dr": lin_init(ks[2], 768, metadata_size),
        "b_dr": jax.random.normal(ks[3], (1, metadata_size), jnp.float32) * 0.01,
        "w1": lin_init(ks[4], concat_size, hidden_size),
        "b1": jax.random.normal(ks[5], (1, hidden_size), jnp.float32) * 0.01,
        "w2": lin_init(ks[6], hidden_size, 1),
        "b2": jax.random.normal(ks[7], (1, 1), jnp.float32) * 0.01,
    }


if __name__ == "__main__":
    # Small synthetic config
    USERS, MOVIES = 32, 64
    USER_EMB, MOVIE_EMB = 16, 16
    METADATA_SIZE, HIDDEN = 32, 32
    B = 8

    key = jax.random.PRNGKey(0)
    k_user, k_movie, k_meta, k_params = jax.random.split(key, 4)

    user = jax.random.randint(k_user, (B,), 0, USERS, dtype=jnp.int32)
    movie = jax.random.randint(k_movie, (B,), 0, MOVIES, dtype=jnp.int32)
    metadata = jax.random.normal(k_meta, (B, 768), jnp.float32)

    params = init_params(k_params, users=USERS, movies=MOVIES,
                         user_emb_size=USER_EMB, movie_emb_size=MOVIE_EMB,
                         metadata_size=METADATA_SIZE, hidden_size=HIDDEN)

    out = deep_recommender_forward(user, movie, metadata, params)
    out = jax.block_until_ready(out)
    assert out.shape == (B, 1)

    # --- Pure-JAX references ---
    ue = params["user_emb"][user]
    me = params["movie_emb"][movie]

    # (a) Exact f32 reference of the original module math (loose check: kernel uses bf16 streams).
    md = metadata @ params["w_dr"] + params["b_dr"]
    x = jnp.concatenate([ue, me, md], axis=-1)
    ref_f32 = (x @ params["w1"] + params["b1"]) @ params["w2"] + params["b2"]
    assert jnp.allclose(out, ref_f32, atol=5e-2, rtol=5e-2)

    # (b) bf16-consistent reference mirroring the exact kernel math (tight check).
    UM = USER_EMB + MOVIE_EMB
    w1_um = params["w1"][:UM]
    w1_d = params["w1"][UM:]
    w_comb = params["w_dr"] @ w1_d
    b1_eff = params["b1"] + params["b_dr"] @ w1_d
    um_b = jnp.concatenate([ue, me], axis=-1).astype(jnp.bfloat16).astype(jnp.float32)
    meta_b = metadata.astype(jnp.bfloat16).astype(jnp.float32)
    h = (um_b @ w1_um.astype(jnp.bfloat16).astype(jnp.float32)
         + meta_b @ w_comb.astype(jnp.bfloat16).astype(jnp.float32)
         + b1_eff)
    ref_bf16 = (h * params["w2"].reshape(1, -1)).sum(-1, keepdims=True) + params["b2"]
    assert jnp.allclose(out, ref_bf16, atol=2e-3, rtol=2e-3)

    print("KERNEL_OK")
</pallas_src>

<mosaic_0001>
module attributes {stable_mosaic.version = 11 : i64} {
  func.func @deep_recommender_kernel(%arg0: i32, %arg1: memref<8x32xbf16, #tpu.memory_space<vmem>>, %arg2: memref<8x768xbf16, #tpu.memory_space<vmem>>, %arg3: memref<32x32xbf16, #tpu.memory_space<vmem>>, %arg4: memref<768x32xbf16, #tpu.memory_space<vmem>>, %arg5: memref<1x32xf32, #tpu.memory_space<vmem>>, %arg6: memref<1x32xf32, #tpu.memory_space<vmem>>, %arg7: memref<1x1xf32, #tpu.memory_space<vmem>>, %arg8: memref<8x1xf32, #tpu.memory_space<vmem>>) attributes {dimension_semantics = [#tpu.dimension_semantics<parallel>], iteration_bounds = array<i64: 1>, scalar_prefetch = 0 : i64, scratch_operands = 0 : i64, tpu.core_type = #tpu.core_type<tc>, window_params = [{transform_indices = @transform_0, window_bounds = array<i64: 8, 32>}, {transform_indices = @transform_1, window_bounds = array<i64: 8, 768>}, {pipeline_mode = #tpu.pipeline_mode<synchronous>, transform_indices = @transform_2, window_bounds = array<i64: 32, 32>}, {pipeline_mode = #tpu.pipeline_mode<synchronous>, transform_indices = @transform_3, window_bounds = array<i64: 768, 32>}, {pipeline_mode = #tpu.pipeline_mode<synchronous>, transform_indices = @transform_4, window_bounds = array<i64: 1, 32>}, {pipeline_mode = #tpu.pipeline_mode<synchronous>, transform_indices = @transform_5, window_bounds = array<i64: 1, 32>}, {pipeline_mode = #tpu.pipeline_mode<synchronous>, transform_indices = @transform_6, window_bounds = array<i64: 1, 1>}, {transform_indices = @transform_7, window_bounds = array<i64: 8, 1>}]} {
    %c0 = arith.constant 0 : index
    %c0_0 = arith.constant 0 : index
    %0 = vector.load %arg1[%c0, %c0_0] : memref<8x32xbf16, #tpu.memory_space<vmem>>, vector<8x32xbf16>
    %c0_1 = arith.constant 0 : index
    %c0_2 = arith.constant 0 : index
    %1 = vector.load %arg3[%c0_1, %c0_2] : memref<32x32xbf16, #tpu.memory_space<vmem>>, vector<32x32xbf16>
    %cst = arith.constant dense<0.000000e+00> : vector<8x32xf32>
    %2 = tpu.matmul %0, %1, %cst {dimension_numbers = #tpu.dot_dimension_numbers<[1], [0], [0], [1], [0, 0, 1, 1], [], []>} : vector<8x32xbf16>, vector<32x32xbf16>, vector<8x32xf32> -> vector<8x32xf32>
    %c0_3 = arith.constant 0 : index
    %c0_4 = arith.constant 0 : index
    %3 = vector.load %arg2[%c0_3, %c0_4] : memref<8x768xbf16, #tpu.memory_space<vmem>>, vector<8x768xbf16>
    %c0_5 = arith.constant 0 : index
    %c0_6 = arith.constant 0 : index
    %4 = vector.load %arg4[%c0_5, %c0_6] : memref<768x32xbf16, #tpu.memory_space<vmem>>, vector<768x32xbf16>
    %cst_7 = arith.constant dense<0.000000e+00> : vector<8x32xf32>
    %5 = tpu.matmul %3, %4, %cst_7 {dimension_numbers = #tpu.dot_dimension_numbers<[1], [0], [0], [1], [0, 0, 1, 1], [], []>} : vector<8x768xbf16>, vector<768x32xbf16>, vector<8x32xf32> -> vector<8x32xf32>
    %6 = arith.addf %2, %5 : vector<8x32xf32>
    %c0_8 = arith.constant 0 : index
    %c0_9 = arith.constant 0 : index
    %7 = vector.load %arg5[%c0_8, %c0_9] : memref<1x32xf32, #tpu.memory_space<vmem>>, vector<1x32xf32>
    %8 = vector.broadcast %7 : vector<1x32xf32> to vector<8x32xf32>
    %9 = arith.addf %6, %8 : vector<8x32xf32>
    %c0_10 = arith.constant 0 : index
    %c0_11 = arith.constant 0 : index
    %10 = vector.load %arg6[%c0_10, %c0_11] : memref<1x32xf32, #tpu.memory_space<vmem>>, vector<1x32xf32>
    %11 = vector.broadcast %10 : vector<1x32xf32> to vector<8x32xf32>
    %12 = arith.mulf %9, %11 : vector<8x32xf32>
    %cst_12 = arith.constant dense<0.000000e+00> : vector<8xf32>
    %13 = vector.multi_reduction <add>, %12, %cst_12 [1] : vector<8x32xf32> to vector<8xf32>
    %14 = vector.shape_cast %13 : vector<8xf32> to vector<8x1xf32>
    %c0_13 = arith.constant 0 : index
    %c0_14 = arith.constant 0 : index
    %15 = vector.load %arg7[%c0_13, %c0_14] : memref<1x1xf32, #tpu.memory_space<vmem>>, vector<1x1xf32>
    %16 = vector.broadcast %15 : vector<1x1xf32> to vector<8x1xf32>
    %17 = arith.addf %14, %16 : vector<8x1xf32>
    %c0_15 = arith.constant 0 : index
    %c0_16 = arith.constant 0 : index
    %18 = vector.load %arg8[%c0_15, %c0_16] : memref<8x1xf32, #tpu.memory_space<vmem>>, vector<8x1xf32>
    tpu.vector_store %arg8[%c0_15, %c0_16], %17 {strides = array<i32>} : memref<8x1xf32, #tpu.memory_space<vmem>>, vector<8x1xf32>,
    return
  }
  func.func @transform_0(%arg0: i32) -> (i32, i32) {
    %c0_i32 = arith.constant 0 : i32
    %c0_i32_0 = arith.constant 0 : i32
    return %arg0, %c0_i32 : i32, i32
  }
  func.func @transform_1(%arg0: i32) -> (i32, i32) {
    %c0_i32 = arith.constant 0 : i32
    %c0_i32_0 = arith.constant 0 : i32
    return %arg0, %c0_i32 : i32, i32
  }
  func.func @transform_2(%arg0: i32) -> (i32, i32) {
    %c0_i32 = arith.constant 0 : i32
    %c0_i32_0 = arith.constant 0 : i32
    %c0_i32_1 = arith.constant 0 : i32
    return %c0_i32, %c0_i32_0 : i32, i32
  }
  func.func @transform_3(%arg0: i32) -> (i32, i32) {
    %c0_i32 = arith.constant 0 : i32
    %c0_i32_0 = arith.constant 0 : i32
    %c0_i32_1 = arith.constant 0 : i32
    return %c0_i32, %c0_i32_0 : i32, i32
  }
  func.func @transform_4(%arg0: i32) -> (i32, i32) {
    %c0_i32 = arith.constant 0 : i32
    %c0_i32_0 = arith.constant 0 : i32
    %c0_i32_1 = arith.constant 0 : i32
    return %c0_i32, %c0_i32_0 : i32, i32
  }
  func.func @transform_5(%arg0: i32) -> (i32, i32) {
    %c0_i32 = arith.constant 0 : i32
    %c0_i32_0 = arith.constant 0 : i32
    %c0_i32_1 = arith.constant 0 : i32
    return %c0_i32, %c0_i32_0 : i32, i32
  }
  func.func @transform_6(%arg0: i32) -> (i32, i32) {
    %c0_i32 = arith.constant 0 : i32
    %c0_i32_0 = arith.constant 0 : i32
    %c0_i32_1 = arith.constant 0 : i32
    return %c0_i32, %c0_i32_0 : i32, i32
  }
  func.func @transform_7(%arg0: i32) -> (i32, i32) {
    %c0_i32 = arith.constant 0 : i32
    %c0_i32_0 = arith.constant 0 : i32
    return %arg0, %c0_i32 : i32, i32
  }
}

</mosaic_0001>

<bundles_post_ra>
// kernel: tpu_custom_call.1
= control target key start
LH: loop header
LB: loop body
LE: loop exit
PB: predicated region body
PF: predicated region fallthrough
CT: control target
= control target key end

     0   :  { %vm532_vm0 = vcmask 261120   ;;  %vm567_vm1 = vcmask 7168   ;;  %s1043_s3 = inlined_call_operand.vmem [shape: bf16[768,32], index: 3, kind: input, shape index: {}]   ;;  %s1044_s1 = inlined_call_operand.vmem [shape: bf16[8,768], index: 1, kind: input, shape index: {}]   ;;  %s1045_s2 = inlined_call_operand.vmem [shape: bf16[32,32], index: 2, kind: input, shape index: {}]   ;;  %s1046_s0 = inlined_call_operand.vmem [shape: bf16[8,32], index: 0, kind: input, shape index: {}]   ;;  %s1047_s4 = inlined_call_operand.vmem [shape: f32[1,32], index: 4, kind: input, shape index: {}]   ;;  %s1048_s5 = inlined_call_operand.vmem [shape: f32[1,32], index: 5, kind: input, shape index: {}]   ;;  %s1049_s6 = inlined_call_operand.<no memory space> [shape: f32[1,1], index: 6, kind: input, shape index: {}]   ;;  %s1050_s7 = inlined_call_operand.vmem [shape: f32[8,1], index: 7, kind: output, shape index: {}]  }
   0x1   :  { %v783_v0 = vld [vmem:[%s1043_s3 + $0x38] sm:$0xff]  ;;  %v782_v3 = vld [vmem:[%s1043_s3 + $0x30] sm:$0xff]  ;;  %v781_v8 = vld [vmem:[%s1043_s3 + $0x28] sm:$0xff] }
   0x2   :  { %v791_v1 = vld [vmem:[%s1043_s3 + $0x78] sm:$0xff]  ;;  %442 = vmatpush.bf16.msra.mxu0 %v783_v0  ;;  %v790_v4 = vld [vmem:[%s1043_s3 + $0x70] sm:$0xff]  ;;  %v789_v9 = vld [vmem:[%s1043_s3 + $0x68] sm:$0xff] }
   0x3   :  { %v799_v2 = vld [vmem:[%s1043_s3 + $0xb8] sm:$0xff]  ;;  %455 = vmatpush.bf16.msra.mxu1 %v791_v1  ;;  %v798_v5 = vld [vmem:[%s1043_s3 + $0xb0] sm:$0xff]  ;;  %v797_v10 = vld [vmem:[%s1043_s3 + $0xa8] sm:$0xff] }
   0x4   :  { %468 = vmatpush.bf16.msra.mxu2 %v799_v2  ;;  %v807_v6 = vld [vmem:[%s1043_s3 + $0xf8] sm:$0xff]  ;;  %v806_v7 = vld [vmem:[%s1043_s3 + $0xf0] sm:$0xff]  ;;  %v805_v11 = vld [vmem:[%s1043_s3 + $0xe8] sm:$0xff] }
   0x5   :  { %481 = vmatpush.bf16.msra.mxu3 %v807_v6  ;;  %v780_v12 = vld [vmem:[%s1043_s3 + $0x20] sm:$0xff]  ;;  %v779_v16 = vld [vmem:[%s1043_s3 + $0x18] sm:$0xff]  ;;  %v778_v20 = vld [vmem:[%s1043_s3 + $0x10] sm:$0xff] }
   0x6   :  { %443 = vmatpush.bf16.msra.mxu0 %v782_v3  ;;  %v788_v13 = vld [vmem:[%s1043_s3 + $0x60] sm:$0xff]  ;;  %v787_v17 = vld [vmem:[%s1043_s3 + $0x58] sm:$0xff]  ;;  %v786_v21 = vld [vmem:[%s1043_s3 + $0x50] sm:$0xff] }
   0x7   :  { %456 = vmatpush.bf16.msra.mxu1 %v790_v4  ;;  %v796_v14 = vld [vmem:[%s1043_s3 + $0xa0] sm:$0xff]  ;;  %v795_v18 = vld [vmem:[%s1043_s3 + $0x98] sm:$0xff]  ;;  %v794_v22 = vld [vmem:[%s1043_s3 + $0x90] sm:$0xff] }
   0x8   :  { %469 = vmatpush.bf16.msra.mxu2 %v798_v5  ;;  %v804_v15 = vld [vmem:[%s1043_s3 + $0xe0] sm:$0xff]  ;;  %v803_v19 = vld [vmem:[%s1043_s3 + $0xd8] sm:$0xff]  ;;  %v802_v23 = vld [vmem:[%s1043_s3 + $0xd0] sm:$0xff] }
   0x9   :  { %482 = vmatpush.bf16.msra.mxu3 %v806_v7  ;;  %v777_v24 = vld [vmem:[%s1043_s3 + $0x8] sm:$0xff]  ;;  %v34_v26 = vld [vmem:[%s1044_s1] sm:$0xff]  ;;  %v815_v34 = vld [vmem:[%s1043_s3 + $0x138] sm:$0xff]  ;;  %v12_v7 = vstv %s1049_s6 }
   0xa   :  { %444 = vmatpush.bf16.msra.mxu0 %v781_v8  ;;  %v785_v25 = vld [vmem:[%s1043_s3 + $0x48] sm:$0xff]  ;;  %v136_v30 = vunpack.c.l.b16 %v34_v26  ;;  %v137_v31 = vunpack.c.h.b16 %v34_v26  ;;  %v776_v32 = vld [vmem:[%s1043_s3] sm:$0xff]  ;;  %v823_v35 = vld [vmem:[%s1043_s3 + $0x178] sm:$0xff]  ;;  %13 = vst [vmem:[#allocation2] sm:$0x1] %v12_v7 }
   0xb   :  { %457 = vmatpush.bf16.msra.mxu1 %v789_v9  ;;  %v793_v27 = vld [vmem:[%s1043_s3 + $0x88] sm:$0xff]  ;;  %v784_v33 = vld [vmem:[%s1043_s3 + $0x40] sm:$0xff]  ;;  %v814_v43 = vld [vmem:[%s1043_s3 + $0x130] sm:$0xff] }
   0xc   :  { %470 = vmatpush.bf16.msra.mxu2 %v797_v10  ;;  %v35_v28 = vld [vmem:[%s1044_s1 + $0x8] sm:$0xff]  ;;  %v792_v36 = vld [vmem:[%s1043_s3 + $0x80] sm:$0xff]  ;;  %v142_v38 = vpack.c.b16 %v136_v30, %v136_v30  ;;  %v143_v39 = vpack.c.b16 %v137_v31, %v137_v31  ;;  %v822_v44 = vld [vmem:[%s1043_s3 + $0x170] sm:$0xff] }
   0xd   :  { %483 = vmatpush.bf16.msra.mxu3 %v805_v11  ;;  %v801_v29 = vld [vmem:[%s1043_s3 + $0xc8] sm:$0xff]  ;;  %v138_v37 = vunpack.c.l.b16 %v35_v28  ;;  %v139_v40 = vunpack.c.h.b16 %v35_v28  ;;  %v800_v41 = vld [vmem:[%s1043_s3 + $0xc0] sm:$0xff]  ;;  %v811_v52 = vld [vmem:[%s1043_s3 + $0x118] sm:$0xff] }
   0xe   :  { %445 = vmatpush.bf16.msra.mxu0 %v780_v12  ;;  %v775_v42 = vld [vmem:[%s1045_s2 + $0x8] sm:$0xff]  ;;  %v774_v47 = vld [vmem:[%s1045_s2] sm:$0xff]  ;;  %v819_v53 = vld [vmem:[%s1043_s3 + $0x158] sm:$0xff] }
   0xf   :  { %458 = vmatpush.bf16.msra.mxu1 %v788_v13  ;;  %v144_v45 = vpack.c.b16 %v138_v37, %v138_v37  ;;  %v145_v46 = vpack.c.b16 %v139_v40, %v139_v40  ;;  %v813_v48 = vld [vmem:[%s1043_s3 + $0x128] sm:$0xff]  ;;  %v812_v50 = vld [vmem:[%s1043_s3 + $0x120] sm:$0xff]  ;;  %v810_v54 = vld [vmem:[%s1043_s3 + $0x110] sm:$0xff] }
  0x10   :  { %471 = vmatpush.bf16.msra.mxu2 %v796_v14  ;;  %v821_v49 = vld [vmem:[%s1043_s3 + $0x168] sm:$0xff]  ;;  %v820_v51 = vld [vmem:[%s1043_s3 + $0x160] sm:$0xff]  ;;  %v818_v55 = vld [vmem:[%s1043_s3 + $0x150] sm:$0xff] }
  0x11   :  { %484 = vmatpush.bf16.msra.mxu3 %v804_v15  ;;  %v29_v56 = vld [vmem:[%s1046_s0] sm:$0xf]  ;;  %v809_v57 = vld [vmem:[%s1043_s3 + $0x108] sm:$0xff]  ;;  %v36_v59 = vld [vmem:[%s1044_s1 + $0x10] sm:$0xff] }
  0x12   :  { %446 = vmatpush.bf16.msra.mxu0 %v779_v16  ;;  %v817_v58 = vld [vmem:[%s1043_s3 + $0x148] sm:$0xff]  ;;  %v140_v60 = vunpack.c.l.b16 %v36_v59  ;;  %v141_v61 = vunpack.c.h.b16 %v36_v59  ;;  %v808_v62 = vld [vmem:[%s1043_s3 + $0x100] sm:$0xff] }
  0x13   :  { %459 = vmatpush.bf16.msra.mxu1 %v787_v17  ;;  %v816_v63 = vld [vmem:[%s1043_s3 + $0x140] sm:$0xff] }
  0x14   :  { %472 = vmatpush.bf16.msra.mxu2 %v795_v18  ;;  %v146_v0 = vpack.c.b16 %v140_v60, %v140_v60  ;;  %v147_v1 = vpack.c.b16 %v141_v61, %v141_v61  ;;  %v826_v28 = vld [vmem:[#allocation2] ss:$0 sm:$0xff] }
  0x15   :  { %485 = vmatpush.bf16.msra.mxu3 %v803_v19  ;;  %v824_v19 = vld [vmem:[%s1047_s4] ss:$0 sm:$0xff] }
  0x16   :  { %447 = vmatpush.bf16.msra.mxu0 %v778_v20 }
  0x17   :  { %460 = vmatpush.bf16.msra.mxu1 %v786_v21 }
  0x18   :  { %473 = vmatpush.bf16.msra.mxu2 %v794_v22  ;;  %v825_v22 = vld [vmem:[%s1048_s5] ss:$0 sm:$0xff] }
  0x19   :  { %486 = vmatpush.bf16.msra.mxu3 %v802_v23 }
  0x1a   :  { %448 = vmatpush.bf16.msra.mxu0 %v777_v24 }
  0x1b   :  { %461 = vmatpush.bf16.msra.mxu1 %v785_v25 }
  0x1c   :  { %474 = vmatpush.bf16.msra.mxu2 %v793_v27 }
  0x1d   :  { %487 = vmatpush.bf16.msra.mxu3 %v801_v29 }
  0x1e   :  { %449 = vmatpush.bf16.msra.mxu0 %v776_v32 }
  0x1f   :  { %462 = vmatpush.bf16.msra.mxu1 %v784_v33 }
  0x20   :  { %475 = vmatpush.bf16.msra.mxu2 %v792_v36 }
  0x21   :  { %450 = vmatmul.bf16.vlgmr.msra.gmra.mxu0 %v142_v38  ;;  %488 = vmatpush.bf16.msra.mxu3 %v800_v41 }
  0x22   :  { %494 = vmatpush.bf16.msrb.mxu0 %v815_v34  ;;  %463 = vmatmul.bf16.vlgmr.msra.gmra.mxu1 %v143_v39 }
  0x23   :  { %507 = vmatpush.bf16.msrb.mxu1 %v823_v35  ;;  %476 = vmatmul.bf16.vlgmr.msra.gmra.mxu2 %v144_v45 }
  0x24   :  { %542 = vmatpush.bf16.msrb.mxu2 %v775_v42  ;;  %489 = vmatmul.bf16.vlgmr.msra.gmra.mxu3 %v145_v46 }
  0x26   :  { %495 = vmatpush.bf16.msrb.mxu0 %v814_v43 }
  0x27   :  { %508 = vmatpush.bf16.msrb.mxu1 %v822_v44 }
  0x28   :  { %543 = vmatpush.bf16.msrb.mxu2 %v774_v47 }
  0x2a   :  { %496 = vmatpush.bf16.msrb.mxu0 %v813_v48 }
  0x2b   :  { %509 = vmatpush.bf16.msrb.mxu1 %v821_v49 }
  0x2e   :  { %497 = vmatpush.bf16.msrb.mxu0 %v812_v50 }
  0x2f   :  { %510 = vmatpush.bf16.msrb.mxu1 %v820_v51 }
  0x32   :  { %498 = vmatpush.bf16.msrb.mxu0 %v811_v52 }
  0x33   :  { %511 = vmatpush.bf16.msrb.mxu1 %v819_v53  ;;  %773 = vmatmul.msk.bf16.vlgmr.msrb.gmra.mxu2 %vm532_vm0, %v29_v56 }
  0x36   :  { %499 = vmatpush.bf16.msrb.mxu0 %v810_v54 }
  0x37   :  { %512 = vmatpush.bf16.msrb.mxu1 %v818_v55 }
  0x3a   :  { %500 = vmatpush.bf16.msrb.mxu0 %v809_v57 }
  0x3b   :  { %513 = vmatpush.bf16.msrb.mxu1 %v817_v58 }
  0x3e   :  { %501 = vmatpush.bf16.msrb.mxu0 %v808_v62 }
  0x3f   :  { %514 = vmatpush.bf16.msrb.mxu1 %v816_v63 }
  0x41   :  { %502 = vmatmul.bf16.vlgmr.msrb.gmra.mxu0 %v146_v0 }
  0x42   :  { %515 = vmatmul.bf16.vlgmr.msrb.gmra.mxu1 %v147_v1 }
  0x9e   :  { %v451_v2 = vpop.f32.mrf.mxu0 }
  0x9f   :  { %v464_v3 = vpop.f32.mrf.mxu1 }
  0xa0   :  { %v465_v11 = vadd.f32 %v464_v3, %v451_v2 }
  0xa6   :  { %v453_v4 = vpop.f32.mrf.mxu0  ;;  %v477_v6 = vpop.f32.mrf.mxu2 }
  0xa7   :  { %v466_v5 = vpop.f32.mrf.mxu1  ;;  %v490_v8 = vpop.f32.mrf.mxu3  ;;  %v478_v12 = vadd.f32 %v477_v6, %v465_v11 }
  0xa9   :  { %v491_v14 = vadd.f32 %v490_v8, %v478_v12 }
  0xae   :  { %v479_v9 = vpop.f32.mrf.mxu2 }
  0xaf   :  { %v492_v10 = vpop.f32.mrf.mxu3 }
  0xb6   :  { %v545_v13 = vpop.f32.mrf.mxu2 }
  0xbe   :  { %v503_v15 = vpop.f32.mrf.mxu0  ;;  %v547_v20 = vpop.f32.mrf.mxu2 }
  0xbf   :  { %v516_v16 = vpop.f32.mrf.mxu1  ;;  %v504_v17 = vadd.f32 %v503_v15, %v491_v14 }
  0xc1   :  { %v517_v18 = vadd.f32 %v516_v16, %v504_v17 }
  0xc3   :  { %v546_v21 = vadd.f32 %v545_v13, %v517_v18 }
  0xc5   :  { %v553_v23 = vadd.f32 %v824_v19, %v546_v21 }
  0xc6   :  { %v505_v24 = vpop.f32.mrf.mxu0 }
  0xc7   :  { %v518_v25 = vpop.f32.mrf.mxu1  ;;  %v558_v26 = vmul.f32 %v825_v22, %v553_v23 }
  0xc9   :  { %v559_v27 = vsel %vm532_vm0, %v558_v26, 0.0 }
  0xca   :  { %560 = vadd.xlane.f32.xlu0 %v559_v27 }
 0x13d   :  { %v561_v29 = vpop.xlane.xlu0 %560 }
 0x13e   :  { %v566_v30 = vadd.f32 %v826_v28, %v561_v29 }
 0x140   :  { %568 = vst.msk [vmem:[%s1050_s7] sm:$0xff] %vm567_vm1, %v566_v30 }

</bundles_post_ra>
